<compile_context>
chip_gen: v7x
topology: tpu7x:2x2x1
jax: 0.10.0
libtpu: 0.0.40
codegen_flags: <defaults>
</compile_context>

<pallas_src>
import functools

import jax
import jax.numpy as jnp
from jax import lax
from jax.experimental import pallas as pl
from jax.experimental.pallas import tpu as pltpu


def _tokenizer_kernel(xt_ref, w_ref, b_ref, g_ref, out_ref):
    """One grid step processes TN tokens, kept lane-dense (tokens in lanes).

    xt_ref : (D, TN)  bf16  -- transposed input tile
    w_ref  : (V, D)   bf16  -- Linear weight (constant index -> resident)
    b_ref  : (V, 1)   f32   -- Linear bias
    g_ref  : (V, TN)  f32   -- Gumbel(0,1) noise for this tile
    out_ref: (1, TN)  i32   -- argmax vocab index per token (lane-dense)
    """
    # Linear: logits^T = W @ x^T   (MXU, bf16 inputs, f32 accumulation)
    logits = jnp.dot(w_ref[...], xt_ref[...],
                     preferred_element_type=jnp.float32)        # (V, TN)

    # gumbel_softmax(tau=1) -> argmax  ==  argmax(logits + bias + gumbel)
    y = logits + b_ref[...] + g_ref[...]                        # (V, TN) f32

    v = y.shape[0]
    ymax = jnp.max(y, axis=0, keepdims=True)                    # (1, TN)
    idx_f = lax.broadcasted_iota(jnp.int32, y.shape, 0).astype(jnp.float32)
    # First maximal index (matches torch.max tie-breaking).
    first = jnp.min(jnp.where(y == ymax, idx_f, jnp.float32(v)),
                    axis=0, keepdims=True)                      # (1, TN)
    out_ref[...] = first.astype(jnp.int32)


@functools.partial(jax.jit, static_argnames=("tile_n",))
def tokenizer_forward(x, weight, bias, key, *, tile_n=256):
    """x: (bs, length, dim) f32; weight: (vocab, dim); bias: (vocab,); key: PRNG key."""
    assert tile_n % 128 == 0, "tile_n must be a multiple of 128 (lane width)"
    bs, length, dim = x.shape
    vocab = weight.shape[0]
    n = bs * length
    n_pad = pl.cdiv(n, tile_n) * tile_n
    grid_n = n_pad // tile_n

    x_flat = x.reshape(n, dim)
    if n_pad != n:
        x_flat = jnp.pad(x_flat, ((0, n_pad - n), (0, 0)))
    xt = x_flat.T.astype(jnp.bfloat16)                          # (dim, n_pad)
    w = weight.astype(jnp.bfloat16)                             # (vocab, dim)
    b = bias.reshape(vocab, 1).astype(jnp.float32)              # (vocab, 1)
    gumbel = jax.random.gumbel(key, (vocab, n_pad), dtype=jnp.float32)

    out = pl.pallas_call(
        _tokenizer_kernel,
        out_shape=jax.ShapeDtypeStruct((1, n_pad), jnp.int32),
        grid_spec=pltpu.PrefetchScalarGridSpec(
            num_scalar_prefetch=0,
            grid=(grid_n,),
            in_specs=[
                pl.BlockSpec((dim, tile_n), lambda i: (0, i)),   # x^T tile
                pl.BlockSpec((vocab, dim), lambda i: (0, 0)),    # weight (resident)
                pl.BlockSpec((vocab, 1), lambda i: (0, 0)),      # bias   (resident)
                pl.BlockSpec((vocab, tile_n), lambda i: (0, i)), # gumbel tile
            ],
            out_specs=pl.BlockSpec((1, tile_n), lambda i: (0, i)),
        ),
        compiler_params=pltpu.CompilerParams(
            dimension_semantics=("parallel",),
        ),
    )(xt, w, b, gumbel)

    return out[0, :n].reshape(bs, length)


if __name__ == "__main__":
    # Small shapes consistent with the module's forward.
    bs, length, rep_dim, vocab_size = 2, 8, 32, 128
    tile_n = 256

    root = jax.random.PRNGKey(0)
    kx, kw, kb, kg = jax.random.split(root, 4)

    weight = (jax.random.normal(kw, (vocab_size, rep_dim), dtype=jnp.float32)
              * (1.0 / jnp.sqrt(rep_dim)))
    bias = jax.random.uniform(kb, (vocab_size,), jnp.float32,
                              minval=-0.05, maxval=0.05)
    x = jax.random.normal(kx, (bs, length, rep_dim), dtype=jnp.float32)

    indexes = tokenizer_forward(x, weight, bias, kg, tile_n=tile_n)
    indexes = jax.block_until_ready(indexes)

    # Pure-JAX reference using identical noise and dtypes.
    n = bs * length
    n_pad = ((n + tile_n - 1) // tile_n) * tile_n
    x_pad = jnp.pad(x.reshape(n, rep_dim), ((0, n_pad - n), (0, 0)))
    gumbel_ref = jax.random.gumbel(kg, (vocab_size, n_pad), dtype=jnp.float32)
    yt_ref = (jnp.dot(weight.astype(jnp.bfloat16), x_pad.T.astype(jnp.bfloat16),
                      preferred_element_type=jnp.float32)
              + bias.reshape(vocab_size, 1) + gumbel_ref)
    ref = jnp.argmax(yt_ref[:, :n], axis=0).astype(jnp.int32).reshape(bs, length)

    assert indexes.shape == (bs, length), indexes.shape
    assert indexes.dtype == jnp.int32
    assert bool(jnp.all((indexes >= 0) & (indexes < vocab_size)))
    assert bool(jnp.array_equal(indexes, ref)), (indexes, ref)

    print("KERNEL_OK")
</pallas_src>

<mosaic_0001>
module attributes {stable_mosaic.version = 11 : i64} {
  func.func @_tokenizer_kernel(%arg0: i32, %arg1: memref<32x256xbf16, #tpu.memory_space<vmem>>, %arg2: memref<128x32xbf16, #tpu.memory_space<vmem>>, %arg3: memref<128x1xf32, #tpu.memory_space<vmem>>, %arg4: memref<128x256xf32, #tpu.memory_space<vmem>>, %arg5: memref<1x256xi32, #tpu.memory_space<vmem>>) attributes {dimension_semantics = [#tpu.dimension_semantics<parallel>], iteration_bounds = array<i64: 1>, scalar_prefetch = 0 : i64, scratch_operands = 0 : i64, tpu.core_type = #tpu.core_type<tc>, window_params = [{transform_indices = @transform_0, window_bounds = array<i64: 32, 256>}, {pipeline_mode = #tpu.pipeline_mode<synchronous>, transform_indices = @transform_1, window_bounds = array<i64: 128, 32>}, {pipeline_mode = #tpu.pipeline_mode<synchronous>, transform_indices = @transform_2, window_bounds = array<i64: 128, 1>}, {transform_indices = @transform_3, window_bounds = array<i64: 128, 256>}, {transform_indices = @transform_4, window_bounds = array<i64: 1, 256>}]} {
    %c0 = arith.constant 0 : index
    %c0_0 = arith.constant 0 : index
    %0 = vector.load %arg2[%c0, %c0_0] : memref<128x32xbf16, #tpu.memory_space<vmem>>, vector<128x32xbf16>
    %c0_1 = arith.constant 0 : index
    %c0_2 = arith.constant 0 : index
    %1 = vector.load %arg1[%c0_1, %c0_2] : memref<32x256xbf16, #tpu.memory_space<vmem>>, vector<32x256xbf16>
    %cst = arith.constant dense<0.000000e+00> : vector<128x256xf32>
    %2 = tpu.matmul %0, %1, %cst {dimension_numbers = #tpu.dot_dimension_numbers<[1], [0], [0], [1], [0, 0, 1, 1], [], []>} : vector<128x32xbf16>, vector<32x256xbf16>, vector<128x256xf32> -> vector<128x256xf32>
    %c0_3 = arith.constant 0 : index
    %c0_4 = arith.constant 0 : index
    %3 = vector.load %arg3[%c0_3, %c0_4] : memref<128x1xf32, #tpu.memory_space<vmem>>, vector<128x1xf32>
    %4 = vector.broadcast %3 : vector<128x1xf32> to vector<128x256xf32>
    %5 = arith.addf %2, %4 : vector<128x256xf32>
    %c0_5 = arith.constant 0 : index
    %c0_6 = arith.constant 0 : index
    %6 = vector.load %arg4[%c0_5, %c0_6] : memref<128x256xf32, #tpu.memory_space<vmem>>, vector<128x256xf32>
    %7 = arith.addf %5, %6 : vector<128x256xf32>
    %cst_7 = arith.constant dense<0xFF800000> : vector<256xf32>
    %8 = vector.multi_reduction <maximumf>, %7, %cst_7 [0] : vector<128x256xf32> to vector<256xf32>
    %9 = vector.shape_cast %8 : vector<256xf32> to vector<1x256xf32>
    %10 = tpu.iota {dimensions = array<i32: 0>} : vector<128x256xi32>
    %11 = arith.sitofp %10 : vector<128x256xi32> to vector<128x256xf32>
    %12 = vector.broadcast %9 : vector<1x256xf32> to vector<128x256xf32>
    %13 = arith.cmpf oeq, %7, %12 : vector<128x256xf32>
    %cst_8 = arith.constant 1.280000e+02 : f32
    %14 = vector.broadcast %cst_8 : f32 to vector<128x256xf32>
    %15 = arith.select %13, %11, %14 : vector<128x256xi1>, vector<128x256xf32>
    %cst_9 = arith.constant dense<0x7F800000> : vector<256xf32>
    %16 = vector.multi_reduction <minimumf>, %15, %cst_9 [0] : vector<128x256xf32> to vector<256xf32>
    %17 = vector.shape_cast %16 : vector<256xf32> to vector<1x256xf32>
    %18 = arith.fptosi %17 : vector<1x256xf32> to vector<1x256xi32>
    %c0_10 = arith.constant 0 : index
    %c0_11 = arith.constant 0 : index
    %19 = vector.load %arg5[%c0_10, %c0_11] : memref<1x256xi32, #tpu.memory_space<vmem>>, vector<1x256xi32>
    tpu.vector_store %arg5[%c0_10, %c0_11], %18 {strides = array<i32>} : memref<1x256xi32, #tpu.memory_space<vmem>>, vector<1x256xi32>,
    return
  }
  func.func @transform_0(%arg0: i32) -> (i32, i32) {
    %c0_i32 = arith.constant 0 : i32
    %c0_i32_0 = arith.constant 0 : i32
    return %c0_i32, %arg0 : i32, i32
  }
  func.func @transform_1(%arg0: i32) -> (i32, i32) {
    %c0_i32 = arith.constant 0 : i32
    %c0_i32_0 = arith.constant 0 : i32
    %c0_i32_1 = arith.constant 0 : i32
    return %c0_i32, %c0_i32_0 : i32, i32
  }
  func.func @transform_2(%arg0: i32) -> (i32, i32) {
    %c0_i32 = arith.constant 0 : i32
    %c0_i32_0 = arith.constant 0 : i32
    %c0_i32_1 = arith.constant 0 : i32
    return %c0_i32, %c0_i32_0 : i32, i32
  }
  func.func @transform_3(%arg0: i32) -> (i32, i32) {
    %c0_i32 = arith.constant 0 : i32
    %c0_i32_0 = arith.constant 0 : i32
    return %c0_i32, %arg0 : i32, i32
  }
  func.func @transform_4(%arg0: i32) -> (i32, i32) {
    %c0_i32 = arith.constant 0 : i32
    %c0_i32_0 = arith.constant 0 : i32
    return %c0_i32, %arg0 : i32, i32
  }
}

</mosaic_0001>

<bundles_post_ra>
// kernel: squeeze.5
= control target key start
LH: loop header
LB: loop body
LE: loop exit
PB: predicated region body
PF: predicated region fallthrough
CT: control target
= control target key end

     0   :  { %s85_s0 = inlined_call_operand.vmem [shape: s32[16], index: 0, kind: input, shape index: {}]   ;;  %s86_s1 = inlined_call_operand.hbm [shape: s32[2,8], index: 1, kind: output, shape index: {}]  }
   0x1   :  { %v5_v0 = vld [vmem:[%s85_s0] sm:$0x1] }
   0x2   :  { %2 = vsyncpa [#allocation1], 0  ;;  %6 = vst [vmem:[#allocation3] sm:$0x1] %v5_v0  ;;  %vm8_vm0 = vcmask 64512   ;;  %s58_s0 = smov 120  }
   0x3   :  { %s59_s8 = smov [#allocation0]  }
   0x4   :  { %s26_s9 = sshll.u32 %s59_s8, 4  ;;  %s27_s9 = int_to_ptr.vmem [resolvable:$true] %s26_s9 }
   0x5   :  { %s34_s10 = scalar_lea.vmem %s27_s9, 32  ;;  %p39_p1 = scmp.lt.s32.totalorder %s27_s9, %s27_s9 }
   0x6   :  { %p35_p0 = scmp.ne.s32.totalorder %s27_s9, %s34_s10  ;;  %p40_p2 = scmp.lt.s32.totalorder %s34_s10, %s34_s10 }
   0x8   :  { %p41_p3 = por %p40_p2, %p39_p1 }
   0x9   :  { %v10_v1 = vld [vmem:[#allocation3] sm:$0x1]  }
   0xa   :  { %v7_v2 = vld [vmem:[#allocation3] sm:$0x1]   ;;  %11 = vrot.lane.b32.xlu0 %v10_v1, %s58_s0  ;;  %p42_p4 = pnand %p41_p3, %p35_p0 }
   0xb   :  { %9 = vst.msk [vmem:[#allocation2] sm:$0x1] %vm8_vm0, %v7_v2  }
  0x7c   :  { %v12_v3 = vpop.permute.xlu0 %11  }
  0x7d   :  { %15 = vst.msk [vmem:[#allocation2 + $0x1] sm:$0x1] %vm8_vm0, %v12_v3  }
  0x84   :  { %v19_v4 = vld [vmem:[#allocation2] sm:$0x3] }
  0x85   :  { %21 = vst [vmem:[#allocation0] sm:$0x3] %v19_v4 }
  0x86   :  { %45 = shalt.err (!%p42_p4)
}
  0x87   :  { %s46_s13 = scalar_lea.hbm %s86_s1, 32 }
  0x88   :  { %p47_p5 = scmp.ne.s32.totalorder %s86_s1, %s46_s13  ;;  %p50_p6 = scmp.lt.u32.totalorder %s46_s13, %s86_s1 }
  0x8a   :  { %p52_p7 = pnand %p50_p6, %p47_p5 }
  0x8c   :  { %55 = shalt.err (!%p52_p7)
}
  0x8d   :  { %29 = dma.vmem_to_hbm [thread:$0]  %s27_s9, 32, %s86_s1, [#allocation1]  }
  0x8e   :  { %56 = dma.done.wait [#allocation1], 32  }
  0x8f   :  { %57 = vsyncadd [#allocation1], 4294967264 }
  0x90   :  { %31 = vsyncpa [#allocation1], 1 }

// kernel: tokenizer_forward.1
= control target key start
LH: loop header
LB: loop body
LE: loop exit
PB: predicated region body
PF: predicated region fallthrough
CT: control target
= control target key end

     0   :  { %v649_v1 = vmov 0   ;;  %vm194_vm0 = vcmask 261120   ;;  %s1304_s0 = inlined_call_operand.vmem [shape: bf16[32,256], index: 0, kind: input, shape index: {}]   ;;  %s1305_s1 = inlined_call_operand.vmem [shape: bf16[128,32], index: 1, kind: input, shape index: {}]   ;;  %s1306_s2 = inlined_call_operand.vmem [shape: f32[128,1], index: 2, kind: input, shape index: {}]   ;;  %s1307_s3 = inlined_call_operand.vmem [shape: f32[128,256], index: 3, kind: input, shape index: {}]   ;;  %s1308_s4 = inlined_call_operand.vmem [shape: s32[1,256], index: 4, kind: output, shape index: {}]  }
   0x1   :  { %v635_v0 = vld [vmem:[%s1304_s0 + $0x4] ss:$8 sps:$4 sm:$0xff]   ;;  %251 = vmatprep.mubr.bf16.mxu0 %v649_v1  ;;  %291 = vmatprep.mubr.bf16.mxu1 %v649_v1  ;;  %v637_v2 = vld [vmem:[%s1304_s0] ss:$8 sps:$4 sm:$0xff]   ;;  %v638_v3 = vld [vmem:[%s1304_s0 + $0x14] ss:$8 sps:$4 sm:$0xff]  }
   0x2   :  { %634 = vset.pattern.permute.xlu1 %v649_v1  ;;  %633 = vset.pattern.permute.xlu0 %v649_v1  ;;  %v640_v4 = vld [vmem:[%s1304_s0 + $0x10] ss:$8 sps:$4 sm:$0xff]   ;;  %v641_v5 = vld [vmem:[%s1305_s1] sm:$0xff]   ;;  %v39_v10 = vld [vmem:[%s1306_s2 + $0x8] sm:$0xff] }
   0x3   :  { %219 = vmatprep.subr.bf16.mxu0 %v635_v0  ;;  %623 = vmatprep.subr.bf16.mxu1 %v635_v0  ;;  %v642_v6 = vld [vmem:[%s1305_s1 + $0x20] sm:$0xff]   ;;  %v40_v7 = vld [vmem:[%s1306_s2 + $0x10] sm:$0xff]  ;;  %v41_v9 = vld [vmem:[%s1306_s2 + $0x18] sm:$0xff] }
   0x4   :  { %220 = vmatpush1.bf16.msra.mxu0 %v637_v2  ;;  %625 = vmatpush1.bf16.msra.mxu1 %v637_v2  ;;  %v38_v8 = vld [vmem:[%s1306_s2] sm:$0xff]  ;;  %v643_v11 = vld [vmem:[%s1305_s1 + $0x8] sm:$0xff]   ;;  %v45_v15 = vld [vmem:[%s1306_s2 + $0x38] sm:$0xff] }
   0x5   :  { %221 = vmatprep.subr.bf16.mxu0 %v638_v3  ;;  %624 = vmatprep.subr.bf16.mxu1 %v638_v3  ;;  %v644_v12 = vld [vmem:[%s1305_s1 + $0x28] sm:$0xff]   ;;  %v42_v14 = vld [vmem:[%s1306_s2 + $0x20] sm:$0xff]  ;;  %v44_v16 = vld [vmem:[%s1306_s2 + $0x30] sm:$0xff] }
   0x6   :  { %66 = vperm.xlu1 %634, %v40_v7   ;;  %56 = vperm.xlu0 %633, %v38_v8   ;;  %v43_v13 = vld [vmem:[%s1306_s2 + $0x28] sm:$0xff]  ;;  %v645_v17 = vld [vmem:[%s1305_s1 + $0x10] sm:$0xff]   ;;  %v46_v20 = vld [vmem:[%s1306_s2 + $0x40] sm:$0xff] }
   0x7   :  { %v646_v18 = vld [vmem:[%s1305_s1 + $0x30] sm:$0xff]   ;;  %v47_v19 = vld [vmem:[%s1306_s2 + $0x48] sm:$0xff]  ;;  %v49_v21 = vld [vmem:[%s1306_s2 + $0x58] sm:$0xff] }
   0x8   :  { %222 = vmatpush1.bf16.msra.mxu0 %v640_v4  ;;  %626 = vmatpush1.bf16.msra.mxu1 %v640_v4  ;;  %v48_v22 = vld [vmem:[%s1306_s2 + $0x50] sm:$0xff]  ;;  %v647_v23 = vld [vmem:[%s1305_s1 + $0x18] sm:$0xff]   ;;  %v51_v25 = vld [vmem:[%s1306_s2 + $0x68] sm:$0xff] }
   0x9   :  { %v648_v24 = vld [vmem:[%s1305_s1 + $0x38] sm:$0xff]   ;;  %v50_v26 = vld [vmem:[%s1306_s2 + $0x60] sm:$0xff]  ;;  %v52_v28 = vld [vmem:[%s1306_s2 + $0x70] sm:$0xff] }
   0xa   :  { %71 = vperm.xlu1 %634, %v41_v9   ;;  %61 = vperm.xlu0 %633, %v39_v10   ;;  %v53_v27 = vld [vmem:[%s1306_s2 + $0x78] sm:$0xff]  ;;  %v332_v48 = vld [vmem:[%s1307_s3] sm:$0xff]  ;;  %v333_v53 = vld [vmem:[%s1307_s3 + $0x8] sm:$0xff] }
   0xb   :  { %615 = vmatmul.mubr.msk.bf16.vlgmr.msra.gmra.mrb[0].mxu0 %vm194_vm0, %v641_v5  ;;  %619 = vmatmul.mubr.msk.bf16.vlgmr.msra.gmra.mrb[0].mxu1 %vm194_vm0, %v642_v6  ;;  %v336_v51 = vld [vmem:[%s1307_s3 + $0x20] sm:$0xff]  ;;  %v337_v57 = vld [vmem:[%s1307_s3 + $0x28] sm:$0xff]  ;;  %v334_v59 = vld [vmem:[%s1307_s3 + $0x10] sm:$0xff] }
   0xc   :  { %261 = vmatprep.mubr.bf16.mxu0 %v649_v1  ;;  %301 = vmatprep.mubr.bf16.mxu1 %v649_v1  ;;  %v338_v63 = vld [vmem:[%s1307_s3 + $0x30] sm:$0xff]  ;;  %v335_v2 = vld [vmem:[%s1307_s3 + $0x18] sm:$0xff] }
   0xd   :  { %v339_v6 = vld [vmem:[%s1307_s3 + $0x38] sm:$0xff] }
   0xe   :  { %81 = vperm.xlu1 %634, %v43_v13   ;;  %76 = vperm.xlu0 %633, %v42_v14  }
  0x12   :  { %91 = vperm.xlu1 %634, %v45_v15   ;;  %86 = vperm.xlu0 %633, %v44_v16  }
  0x13   :  { %616 = vmatmul.mubr.msk.bf16.gmra.mrb[4].mxu0 %vm194_vm0, %v643_v11  ;;  %620 = vmatmul.mubr.msk.bf16.gmra.mrb[4].mxu1 %vm194_vm0, %v644_v12 }
  0x14   :  { %271 = vmatprep.mubr.bf16.mxu0 %v649_v1  ;;  %311 = vmatprep.mubr.bf16.mxu1 %v649_v1 }
  0x16   :  { %101 = vperm.xlu1 %634, %v47_v19   ;;  %96 = vperm.xlu0 %633, %v46_v20  }
  0x1a   :  { %111 = vperm.xlu1 %634, %v49_v21   ;;  %106 = vperm.xlu0 %633, %v48_v22   ;;  %v340_v22 = vld [vmem:[%s1307_s3 + $0x40] sm:$0xff] }
  0x1b   :  { %617 = vmatmul.mubr.msk.bf16.gmra.mrb[8].mxu0 %vm194_vm0, %v645_v17  ;;  %621 = vmatmul.mubr.msk.bf16.gmra.mrb[8].mxu1 %vm194_vm0, %v646_v18 }
  0x1c   :  { %281 = vmatprep.mubr.bf16.mxu0 %v649_v1  ;;  %321 = vmatprep.mubr.bf16.mxu1 %v649_v1 }
  0x1e   :  { %121 = vperm.xlu1 %634, %v51_v25   ;;  %116 = vperm.xlu0 %633, %v50_v26   ;;  %v341_v26 = vld [vmem:[%s1307_s3 + $0x48] sm:$0xff] }
  0x22   :  { %131 = vperm.xlu1 %634, %v53_v27   ;;  %126 = vperm.xlu0 %633, %v52_v28  }
  0x23   :  { %618 = vmatmul.mubr.msk.bf16.gmra.mrb[12].mxu0 %vm194_vm0, %v647_v23  ;;  %622 = vmatmul.mubr.msk.bf16.gmra.mrb[12].mxu1 %vm194_vm0, %v648_v24 }
  0x85   :  { %v67_v29 = vpop.permute.xlu1 %66  ;;  %v57_v30 = vpop.permute.xlu0 %56 }
  0x89   :  { %v72_v31 = vpop.permute.xlu1 %71  ;;  %v62_v32 = vpop.permute.xlu0 %61 }
  0x8d   :  { %v768_v33 = vpop.permute.xlu1 %81  ;;  %v77_v34 = vpop.permute.xlu0 %76 }
  0x91   :  { %v770_v35 = vpop.permute.xlu1 %91  ;;  %v772_v36 = vpop.permute.xlu0 %86 }
  0x95   :  { %v782_v45 = vpop.permute.xlu1 %101  ;;  %v97_v46 = vpop.permute.xlu0 %96 }
  0x99   :  { %v112_v17 = vpop.permute.xlu1 %111  ;;  %v107_v18 = vpop.permute.xlu0 %106 }
  0xde   :  { %v253_v37 = vpop.f32.mrb[0].mxu0  ;;  %v774_v38 = vpop.f32.mrb[0].mxu1 }
  0xdf   :  { %v255_v39 = vpop.f32.mrb[1].mxu0  ;;  %v776_v40 = vpop.f32.mrb[1].mxu1  ;;  %v254_v47 = vadd.f32 %v253_v37, %v57_v30 }
  0xe0   :  { %v257_v41 = vpop.f32.mrb[2].mxu0  ;;  %v778_v42 = vpop.f32.mrb[2].mxu1  ;;  %v256_v49 = vadd.f32 %v255_v39, %v57_v30  ;;  %v342_v30 = vld [vmem:[%s1307_s3 + $0x50] sm:$0xff] }
  0xe1   :  { %v259_v43 = vpop.f32.mrb[3].mxu0  ;;  %v780_v44 = vpop.f32.mrb[3].mxu1  ;;  %v258_v54 = vadd.f32 %v257_v41, %v62_v32  ;;  %v804_v1 = vadd.f32 %v332_v48, %v254_v47  ;;  %v343_v41 = vld [vmem:[%s1307_s3 + $0x58] sm:$0xff] }
  0xe2   :  { %v260_v60 = vadd.f32 %v259_v43, %v62_v32  ;;  %v816_v8 = vadd.f32 %v333_v53, %v256_v49 }
  0xe3   :  { %v820_v11 = vadd.f32 %v334_v59, %v258_v54  ;;  %v350_v59 = vld [vmem:[%s1307_s3 + $0x90] sm:$0xff] }
  0xe4   :  { %v826_v14 = vadd.f32 %v335_v2, %v260_v60  ;;  %v351_v60 = vld [vmem:[%s1307_s3 + $0x98] sm:$0xff]  ;;  %v352_v2 = vld [vmem:[%s1307_s3 + $0xa0] sm:$0xff] }
  0xe6   :  { %v263_v50 = vpop.f32.mrb[4].mxu0  ;;  %v790_v52 = vpop.f32.mrb[4].mxu1 }
  0xe7   :  { %v264_v55 = vadd.f32 %v263_v50, %v67_v29  ;;  %v265_v56 = vpop.f32.mrb[5].mxu0  ;;  %v305_v58 = vpop.f32.mrb[5].mxu1  ;;  %v294_v50 = vadd.f32 %v774_v38, %v97_v46  ;;  %v298_v38 = vadd.f32 %v778_v42, %v782_v45 }
  0xe8   :  { %v266_v61 = vadd.f32 %v265_v56, %v67_v29  ;;  %v267_v62 = vpop.f32.mrb[6].mxu0  ;;  %v307_v0 = vpop.f32.mrb[6].mxu1 }
  0xe9   :  { %v809_v3 = vadd.f32 %v336_v51, %v264_v55  ;;  %v268_v4 = vadd.f32 %v267_v62, %v72_v31  ;;  %v269_v5 = vpop.f32.mrb[7].mxu0  ;;  %v814_v7 = vpop.f32.mrb[7].mxu1  ;;  %v296_v51 = vadd.f32 %v776_v40, %v97_v46  ;;  %v300_v40 = vadd.f32 %v780_v44, %v782_v45  ;;  %v344_v44 = vld [vmem:[%s1307_s3 + $0x60] sm:$0xff] }
  0xea   :  { %v818_v9 = vadd.f32 %v337_v57, %v266_v61  ;;  %v270_v10 = vadd.f32 %v269_v5, %v72_v31  ;;  %v122_v55 = vpop.permute.xlu1 %121  ;;  %v117_v56 = vpop.permute.xlu0 %116  ;;  %v348_v57 = vld [vmem:[%s1307_s3 + $0x80] sm:$0xff]  ;;  %v304_v61 = vadd.f32 %v790_v52, %v107_v18  ;;  %v306_v62 = vadd.f32 %v305_v58, %v107_v18  ;;  %v354_v18 = vld [vmem:[%s1307_s3 + $0xb0] sm:$0xff] }
  0xeb   :  { %v396_v12 = vmax.f32 %v804_v1, %v809_v3  ;;  %v824_v13 = vadd.f32 %v338_v63, %v268_v4  ;;  %v353_v4 = vld [vmem:[%s1307_s3 + $0xa8] sm:$0xff]  ;;  %v308_v5 = vadd.f32 %v307_v0, %v112_v17 }
  0xec   :  { %v417_v15 = vmax.f32 %v816_v8, %v818_v9  ;;  %v830_v16 = vadd.f32 %v339_v6, %v270_v10  ;;  %v345_v6 = vld [vmem:[%s1307_s3 + $0x68] sm:$0xff] }
  0xed   :  { %v397_v19 = vmax.f32 %v820_v11, %v824_v13 }
  0xee   :  { %v418_v20 = vmax.f32 %v826_v14, %v830_v16  ;;  %v273_v21 = vpop.f32.mrb[8].mxu0  ;;  %v839_v23 = vpop.f32.mrb[8].mxu1 }
  0xef   :  { %v274_v24 = vadd.f32 %v273_v21, %v77_v34  ;;  %v275_v25 = vpop.f32.mrb[9].mxu0  ;;  %v844_v27 = vpop.f32.mrb[9].mxu1  ;;  %v346_v21 = vld [vmem:[%s1307_s3 + $0x70] sm:$0xff] }
  0xf0   :  { %v276_v28 = vadd.f32 %v275_v25, %v77_v34  ;;  %v277_v29 = vpop.f32.mrb[10].mxu0  ;;  %v849_v31 = vpop.f32.mrb[10].mxu1  ;;  %v922_v25 = vadd.f32 %v351_v60, %v300_v40  ;;  %v356_v40 = vld [vmem:[%s1307_s3 + $0xc0] sm:$0xff] }
  0xf1   :  { %v851_v32 = vadd.f32 %v340_v22, %v274_v24  ;;  %v278_v37 = vadd.f32 %v277_v29, %v768_v33  ;;  %v279_v39 = vpop.f32.mrb[11].mxu0  ;;  %v857_v43 = vpop.f32.mrb[11].mxu1  ;;  %v920_v24 = vadd.f32 %v350_v59, %v298_v38  ;;  %v316_v59 = vadd.f32 %v844_v27, %v117_v56  ;;  %v358_v27 = vld [vmem:[%s1307_s3 + $0xd0] sm:$0xff] }
  0xf2   :  { %v859_v47 = vadd.f32 %v341_v26, %v276_v28  ;;  %v280_v34 = vadd.f32 %v279_v39, %v768_v33  ;;  %v349_v33 = vld [vmem:[%s1307_s3 + $0x88] sm:$0xff]  ;;  %v355_v26 = vld [vmem:[%s1307_s3 + $0xb8] sm:$0xff] }
  0xf3   :  { %v398_v48 = vmax.f32 %v396_v12, %v851_v32  ;;  %v863_v49 = vadd.f32 %v342_v30, %v278_v37  ;;  %v908_v12 = vadd.f32 %v348_v57, %v294_v50  ;;  %v933_v30 = vadd.f32 %v352_v2, %v304_v61 }
  0xf4   :  { %v868_v53 = vmax.f32 %v417_v15, %v859_v47  ;;  %v870_v54 = vadd.f32 %v343_v41, %v280_v34  ;;  %v910_v15 = vadd.f32 %v349_v33, %v296_v51  ;;  %v935_v37 = vadd.f32 %v353_v4, %v306_v62  ;;  %v127_v33 = vpop.permute.xlu0 %126 }
  0xf5   :  { %v883_v46 = vmax.f32 %v397_v19, %v863_v49  ;;  %v310_v19 = vadd.f32 %v814_v7, %v112_v17  ;;  %v940_v34 = vadd.f32 %v354_v18, %v308_v5  ;;  %v314_v50 = vadd.f32 %v839_v23, %v117_v56  ;;  %v357_v23 = vld [vmem:[%s1307_s3 + $0xc8] sm:$0xff]  ;;  %v360_v56 = vld [vmem:[%s1307_s3 + $0xe0] sm:$0xff] }
  0xf6   :  { %v893_v63 = vmax.f32 %v418_v20, %v870_v54  ;;  %v283_v42 = vpop.f32.mrb[12].mxu0  ;;  %v323_v45 = vpop.f32.mrb[12].mxu1 }
  0xf7   :  { %v284_v52 = vadd.f32 %v283_v42, %v772_v36  ;;  %v285_v58 = vpop.f32.mrb[13].mxu0  ;;  %v325_v10 = vpop.f32.mrb[13].mxu1  ;;  %v946_v38 = vadd.f32 %v355_v26, %v310_v19  ;;  %v324_v62 = vadd.f32 %v323_v45, %v127_v33  ;;  %v973_v4 = vadd.f32 %v356_v40, %v314_v50 }
  0xf8   :  { %v286_v0 = vadd.f32 %v285_v58, %v772_v36  ;;  %v287_v20 = vpop.f32.mrb[14].mxu0  ;;  %v327_v22 = vpop.f32.mrb[14].mxu1  ;;  %v347_v36 = vld [vmem:[%s1307_s3 + $0x78] sm:$0xff]  ;;  %v983_v58 = vadd.f32 %v357_v23, %v316_v59 }
  0xf9   :  { %v927_v28 = vadd.f32 %v344_v44, %v284_v52  ;;  %v288_v7 = vadd.f32 %v287_v20, %v770_v35  ;;  %v289_v17 = vpop.f32.mrb[15].mxu0  ;;  %v329_v29 = vpop.f32.mrb[15].mxu1 }
  0xfa   :  { %v937_v39 = vadd.f32 %v345_v6, %v286_v0  ;;  %v290_v41 = vadd.f32 %v289_v17, %v770_v35  ;;  %v132_v44 = vpop.permute.xlu1 %131  ;;  %v992_v0 = vadd.f32 %v360_v56, %v324_v62 }
  0xfb   :  { %v400_v51 = vmax.f32 %v398_v48, %v927_v28  ;;  %v944_v57 = vadd.f32 %v346_v21, %v288_v7  ;;  %v318_v48 = vadd.f32 %v849_v31, %v122_v55  ;;  %v326_v31 = vadd.f32 %v325_v10, %v127_v33 }
  0xfc   :  { %v421_v35 = vmax.f32 %v868_v53, %v937_v39  ;;  %v954_v60 = vadd.f32 %v347_v36, %v290_v41  ;;  %v320_v53 = vadd.f32 %v857_v43, %v122_v55  ;;  %v361_v43 = vld [vmem:[%s1307_s3 + $0xe8] sm:$0xff]  ;;  %v328_v52 = vadd.f32 %v327_v22, %v132_v44  ;;  %v363_v22 = vld [vmem:[%s1307_s3 + $0xf8] sm:$0xff] }
  0xfd   :  { %v402_v61 = vmax.f32 %v400_v51, %v908_v12  ;;  %v401_v42 = vmax.f32 %v883_v46, %v944_v57  ;;  %v359_v46 = vld [vmem:[%s1307_s3 + $0xd8] sm:$0xff]  ;;  %v330_v18 = vadd.f32 %v329_v29, %v132_v44  ;;  %v990_v19 = vadd.f32 %v358_v27, %v318_v48 }
  0xfe   :  { %v423_v2 = vmax.f32 %v421_v35, %v910_v15  ;;  %v422_v45 = vmax.f32 %v893_v63, %v954_v60  ;;  %v362_v63 = vld [vmem:[%s1307_s3 + $0xf0] sm:$0xff]  ;;  %v999_v26 = vadd.f32 %v359_v46, %v320_v53  ;;  %v1001_v7 = vadd.f32 %v361_v43, %v326_v31 }
  0xff   :  { %v404_v5 = vmax.f32 %v402_v61, %v933_v30  ;;  %v403_v55 = vmax.f32 %v401_v42, %v920_v24  ;;  %v1006_v41 = vadd.f32 %v362_v63, %v328_v52  ;;  %v1010_v33 = vadd.f32 %v363_v22, %v330_v18 }
 0x100   :  { %v425_v6 = vmax.f32 %v423_v2, %v935_v37  ;;  %v424_v10 = vmax.f32 %v422_v45, %v922_v25  ;;  %v1309_v35 = vlaneseq }
 0x101   :  { %v406_v20 = vmax.f32 %v404_v5, %v973_v4  ;;  %v405_v21 = vmax.f32 %v403_v55, %v940_v34 }
 0x102   :  { %v427_v17 = vmax.f32 %v425_v6, %v983_v58  ;;  %v426_v36 = vmax.f32 %v424_v10, %v946_v38  ;;  %v1016_v42 = vshrl.u32 %v1309_v35, 7 }
 0x103   :  { %v408_v29 = vmax.f32 %v406_v20, %v992_v0  ;;  %v407_v50 = vmax.f32 %v405_v21, %v990_v19 }
 0x104   :  { %v429_v51 = vmax.f32 %v427_v17, %v1001_v7  ;;  %v428_v40 = vmax.f32 %v426_v36, %v999_v26  ;;  %v1019_v2 = vadd.s32 8, %v1016_v42  ;;  %v1022_v31 = vadd.s32 16, %v1016_v42 }
 0x105   :  { %v409_v59 = vmax.f32 %v407_v50, %v1006_v41  ;;  %v1025_v45 = vadd.s32 24, %v1016_v42  ;;  %v1028_v43 = vadd.s32 32, %v1016_v42  ;;  %v1031_v55 = vadd.s32 40, %v1016_v42 }
 0x106   :  { %v430_v23 = vmax.f32 %v428_v40, %v1010_v33  ;;  %v1034_v52 = vadd.s32 48, %v1016_v42  ;;  %v1037_v6 = vadd.s32 56, %v1016_v42  ;;  %v1040_v63 = vadd.s32 64, %v1016_v42 }
 0x107   :  { %v410_v48 = vmax.f32 %v408_v29, %v409_v59  ;;  %v1043_v10 = vadd.s32 72, %v1016_v42  ;;  %v1046_v21 = vadd.s32 80, %v1016_v42  ;;  %v1049_v22 = vadd.s32 88, %v1016_v42 }
 0x108   :  { %v431_v61 = vmax.f32 %v429_v51, %v430_v23  ;;  %v1052_v17 = vadd.s32 96, %v1016_v42  ;;  %v1055_v36 = vadd.s32 104, %v1016_v42  ;;  %v1058_v29 = vadd.s32 112, %v1016_v42 }
 0x109   :  { %v411_v62 = vrot.slane %v410_v48, 4  ;;  %v1310_v50 = vcvt.s32.f32 %v1016_v42  ;;  %v456_v51 = vcvt.s32.f32 %v1019_v2  ;;  %v457_v59 = vcvt.s32.f32 %v1022_v31 }
 0x10a   :  { %v432_v44 = vrot.slane %v431_v61, 4  ;;  %v458_v23 = vcvt.s32.f32 %v1025_v45  ;;  %v1314_v2 = vcvt.s32.f32 %v1052_v17 }
 0x10b   :  { %v412_v27 = vmax.f32 %v410_v48, %v411_v62  ;;  %v1311_v48 = vcvt.s32.f32 %v1028_v43  ;;  %v461_v62 = vcvt.s32.f32 %v1034_v52  ;;  %v1323_v52 = vcvt.s32.f32 %v1043_v10 }
 0x10c   :  { %v433_v53 = vmax.f32 %v431_v61, %v432_v44  ;;  %v460_v61 = vcvt.s32.f32 %v1031_v55  ;;  %v462_v44 = vcvt.s32.f32 %v1037_v6 }
 0x10d   :  { %v413_v56 = vrot.slane %v412_v27, 2 }
 0x10e   :  { %v434_v46 = vrot.slane %v433_v53, 2 }
 0x10f   :  { %v414_v5 = vmax.f32 %v412_v27, %v413_v56  ;;  %v463_v56 = vcvt.s32.f32 %v1040_v63 }
 0x110   :  { %v435_v18 = vmax.f32 %v433_v53, %v434_v46  ;;  %v1103_v53 = vadd.s32 120, %v1016_v42 }
 0x111   :  { %v415_v20 = vrot.slane %v414_v5, 1 }
 0x112   :  { %v436_v27 = vrot.slane %v435_v18, 1 }
 0x113   :  { %v1062_v40 = vmax.f32 %v414_v5, %v415_v20 }
 0x114   :  { %v1107_v5 = vmax.f32 %v435_v18, %v436_v27  ;;  %v466_v27 = vcvt.s32.f32 %v1049_v22 }
 0x115   :  { %vm471_vm1 = vcmp.eq.f32.partialorder %v804_v1, %v1062_v40  ;;  %vm473_vm2 = vcmp.eq.f32.partialorder %v820_v11, %v1062_v40  ;;  %vm475_vm3 = vcmp.eq.f32.partialorder %v809_v3, %v1062_v40  ;;  %vm477_vm4 = vcmp.eq.f32.partialorder %v824_v13, %v1062_v40 }
 0x116   :  { %vm479_vm5 = vcmp.eq.f32.partialorder %v851_v32, %v1062_v40  ;;  %vm481_vm6 = vcmp.eq.f32.partialorder %v863_v49, %v1062_v40  ;;  %vm483_vm7 = vcmp.eq.f32.partialorder %v927_v28, %v1062_v40  ;;  %vm485_vm8 = vcmp.eq.f32.partialorder %v944_v57, %v1062_v40 }
 0x117   :  { %vm487_vm9 = vcmp.eq.f32.partialorder %v908_v12, %v1062_v40  ;;  %vm489_vm10 = vcmp.eq.f32.partialorder %v920_v24, %v1062_v40  ;;  %vm491_vm11 = vcmp.eq.f32.partialorder %v933_v30, %v1062_v40  ;;  %vm493_vm12 = vcmp.eq.f32.partialorder %v940_v34, %v1062_v40 }
 0x118   :  { %vm495_vm13 = vcmp.eq.f32.partialorder %v973_v4, %v1062_v40  ;;  %vm497_vm14 = vcmp.eq.f32.partialorder %v990_v19, %v1062_v40  ;;  %v503_v20 = vsel %vm471_vm1, %v1310_v50, 128.0  ;;  %v505_v35 = vsel %vm473_vm2, %v456_v51, 128.0 }
 0x119   :  { %v507_v46 = vsel %vm475_vm3, %v457_v59, 128.0  ;;  %v509_v18 = vsel %vm477_vm4, %v458_v23, 128.0  ;;  %v465_v1 = vcvt.s32.f32 %v1046_v21  ;;  %v511_v3 = vsel %vm479_vm5, %v1311_v48, 128.0 }
 0x11a   :  { %v513_v13 = vsel %vm481_vm6, %v460_v61, 128.0  ;;  %v515_v50 = vsel %vm483_vm7, %v461_v62, 128.0  ;;  %v517_v11 = vsel %vm485_vm8, %v462_v44, 128.0  ;;  %v535_v32 = vmin.f32 %v503_v20, %v507_v46 }
 0x11b   :  { %v536_v48 = vmin.f32 %v505_v35, %v509_v18  ;;  %vm472_vm1 = vcmp.eq.f32.partialorder %v816_v8, %v1107_v5  ;;  %vm474_vm2 = vcmp.eq.f32.partialorder %v826_v14, %v1107_v5  ;;  %vm476_vm3 = vcmp.eq.f32.partialorder %v818_v9, %v1107_v5 }
 0x11c   :  { %vm478_vm4 = vcmp.eq.f32.partialorder %v830_v16, %v1107_v5  ;;  %v537_v49 = vmin.f32 %v535_v32, %v511_v3  ;;  %vm488_vm0 = vcmp.eq.f32.partialorder %v910_v15, %v1107_v5  ;;  %vm490_vm15 = vcmp.eq.f32.partialorder %v922_v25, %v1107_v5 }
 0x11d   :  { %v538_v28 = vmin.f32 %v536_v48, %v513_v13  ;;  %vm492_vm5 = vcmp.eq.f32.partialorder %v935_v37, %v1107_v5  ;;  %vm498_vm8 = vcmp.eq.f32.partialorder %v999_v26, %v1107_v5  ;;  %v519_v48 = vsel %vm487_vm9, %v463_v56, 128.0 }
 0x11e   :  { %v539_v57 = vmin.f32 %v537_v49, %v515_v50  ;;  %v1312_v46 = vcvt.s32.f32 %v1043_v10  ;;  %vm500_vm6 = vcmp.eq.f32.partialorder %v1001_v7, %v1107_v5  ;;  %vm502_vm7 = vcmp.eq.f32.partialorder %v1010_v33, %v1107_v5 }
 0x11f   :  { %v540_v35 = vmin.f32 %v538_v28, %v517_v11  ;;  %v469_v50 = vcvt.s32.f32 %v1058_v29  ;;  %v470_v18 = vcvt.s32.f32 %v1103_v53  ;;  %v523_v12 = vsel %vm491_vm11, %v465_v1, 128.0 }
 0x120   :  { %v521_v20 = vsel %vm489_vm10, %v1312_v46, 128.0  ;;  %v541_v11 = vmin.f32 %v539_v57, %v519_v48  ;;  %v525_v24 = vsel %vm493_vm12, %v466_v27, 128.0  ;;  %v1313_v13 = vcvt.s32.f32 %v1016_v42 }
 0x121   :  { %v542_v3 = vmin.f32 %v540_v35, %v521_v20  ;;  %v506_v53 = vsel %vm474_vm2, %v456_v51, 128.0  ;;  %v508_v34 = vsel %vm476_vm3, %v457_v59, 128.0  ;;  %v510_v8 = vsel %vm478_vm4, %v458_v23, 128.0 }
 0x122   :  { %v504_v29 = vsel %vm472_vm1, %v1313_v13, 128.0  ;;  %v543_v30 = vmin.f32 %v541_v11, %v523_v12  ;;  %v527_v14 = vsel %vm495_vm13, %v1314_v2, 128.0  ;;  %v1315_v51 = vcvt.s32.f32 %v1055_v36 }
 0x123   :  { %v544_v32 = vmin.f32 %v542_v3, %v525_v24  ;;  %vm1316_vm9 = vcmp.eq.f32.partialorder %v992_v0, %v1062_v40  ;;  %vm1317_vm10 = vcmp.eq.f32.partialorder %v1006_v41, %v1062_v40  ;;  %v556_v23 = vmin.f32 %v504_v29, %v508_v34 }
 0x124   :  { %v529_v31 = vsel %vm497_vm14, %v1315_v51, 128.0  ;;  %v545_v9 = vmin.f32 %v543_v30, %v527_v14  ;;  %v531_v45 = vsel %vm1316_vm9, %v469_v50, 128.0  ;;  %v533_v16 = vsel %vm1317_vm10, %v470_v18, 128.0 }
 0x125   :  { %v546_v59 = vmin.f32 %v544_v32, %v529_v31  ;;  %v557_v49 = vmin.f32 %v506_v53, %v510_v8  ;;  %v1318_v57 = vcvt.s32.f32 %v1028_v43  ;;  %vm1319_vm11 = vcmp.eq.f32.partialorder %v859_v47, %v1107_v5 }
 0x126   :  { %v547_v4 = vmin.f32 %v545_v9, %v531_v45  ;;  %vm1320_vm12 = vcmp.eq.f32.partialorder %v870_v54, %v1107_v5  ;;  %vm1321_vm13 = vcmp.eq.f32.partialorder %v937_v39, %v1107_v5  ;;  %vm1322_vm14 = vcmp.eq.f32.partialorder %v954_v60, %v1107_v5 }
 0x127   :  { %v548_v28 = vmin.f32 %v546_v59, %v533_v16  ;;  %v512_v19 = vsel %vm1319_vm11, %v1318_v57, 128.0  ;;  %v514_v0 = vsel %vm1320_vm12, %v460_v61, 128.0  ;;  %v516_v40 = vsel %vm1321_vm13, %v461_v62, 128.0 }
 0x128   :  { %v558_v35 = vmin.f32 %v556_v23, %v512_v19  ;;  %v559_v48 = vmin.f32 %v557_v49, %v514_v0  ;;  %v518_v47 = vsel %vm1322_vm14, %v462_v44, 128.0  ;;  %v520_v54 = vsel %vm488_vm0, %v463_v56, 128.0 }
 0x129   :  { %v549_v41 = vmin.f32 %v547_v4, %v548_v28  ;;  %v522_v39 = vsel %vm490_vm15, %v1323_v52, 128.0  ;;  %v524_v60 = vsel %vm492_vm5, %v465_v1, 128.0  ;;  %vm1324_vm0 = vcmp.eq.f32.partialorder %v946_v38, %v1107_v5 }
 0x12a   :  { %v560_v43 = vmin.f32 %v558_v35, %v516_v40  ;;  %v561_v55 = vmin.f32 %v559_v48, %v518_v47  ;;  %v526_v15 = vsel %vm1324_vm0, %v466_v27, 128.0  ;;  %v1325_v25 = vmov %v1314_v2 }
 0x12b   :  { %v550_v46 = vrot.slane %v549_v41, 4  ;;  %vm1326_vm15 = vcmp.eq.f32.partialorder %v983_v58, %v1107_v5  ;;  %v1327_v21 = vmov %v1315_v51  ;;  %v532_v38 = vsel %vm500_vm6, %v469_v50, 128.0 }
 0x12c   :  { %v562_v6 = vmin.f32 %v560_v43, %v520_v54  ;;  %v563_v61 = vmin.f32 %v561_v55, %v522_v39  ;;  %v528_v56 = vsel %vm1326_vm15, %v1325_v25, 128.0  ;;  %v530_v37 = vsel %vm498_vm8, %v1327_v21, 128.0 }
 0x12d   :  { %v551_v62 = vmin.f32 %v549_v41, %v550_v46  ;;  %v534_v17 = vsel %vm502_vm7, %v470_v18, 128.0  ;;  %v650_v29 = vmov 1966171168   ;;  %v1328_v14 = vlaneseq }
 0x12e   :  { %v564_v63 = vmin.f32 %v562_v6, %v524_v60  ;;  %v565_v10 = vmin.f32 %v563_v61, %v526_v15  ;;  %v581_v53 = vunpack.c.l.s4 %v650_v29 }
 0x12f   :  { %v552_v44 = vrot.slane %v551_v62, 2  ;;  %vm596_vm1 = vcmp.lt.s32.totalorder %v1328_v14, 256 }
 0x130   :  { %v566_v22 = vmin.f32 %v564_v63, %v528_v56  ;;  %v567_v1 = vmin.f32 %v565_v10, %v530_v37  ;;  %v582_v50 = vunpack.c.0.s8 %v581_v53 }
 0x131   :  { %v553_v27 = vmin.f32 %v551_v62, %v552_v44 }
 0x132   :  { %v568_v20 = vmin.f32 %v566_v22, %v532_v38  ;;  %v569_v58 = vmin.f32 %v567_v1, %v534_v17  ;;  %v585_v5 = vsub.s32 %v582_v50, %v1016_v42 }
 0x133   :  { %v554_v3 = vrot.slane %v553_v27, 1 }
 0x134   :  { %v570_v11 = vmin.f32 %v568_v20, %v569_v58 }
 0x135   :  { %v555_v24 = vmin.f32 %v553_v27, %v554_v3 }
 0x136   :  { %v571_v36 = vrot.slane %v570_v11, 4 }
 0x137   :  { %v627_v30 = vtrunc.f32 %v555_v24 }
 0x138   :  { %v572_v12 = vmin.f32 %v570_v11, %v571_v36 }
 0x139   :  { %v628_v34 = vcvt.f32.s32 %v627_v30 }
 0x13a   :  { %v573_v26 = vrot.slane %v572_v12, 2 }
 0x13c   :  { %v574_v13 = vmin.f32 %v572_v12, %v573_v26 }
 0x13e   :  { %v575_v32 = vrot.slane %v574_v13, 1 }
 0x140   :  { %v576_v7 = vmin.f32 %v574_v13, %v575_v32 }
 0x142   :  { %v629_v8 = vtrunc.f32 %v576_v7 }
 0x144   :  { %v630_v33 = vcvt.f32.s32 %v629_v8 }
 0x146   :  { %v579_v18 = vcombine.low %v628_v34, %v630_v33 }
 0x148   :  { %v586_v2 = vrot.slane %v579_v18, %v585_v5 }
 0x14a   :  { %v593_v51 = vrot.slane %v586_v2, %v585_v5 }
 0x14c   :  { %598 = vst.msk [vmem:[%s1308_s4] sm:$0x3] %vm596_vm1, %v593_v51 }

</bundles_post_ra>
